<compile_context>
chip_gen: v5e
topology: v5e:2x2
jax: 0.10.0
libtpu: 0.0.40
codegen_flags: <defaults>
</compile_context>

<pallas_src>
import jax
import jax.numpy as jnp
from jax.experimental import pallas as pl
from jax.experimental.pallas import tpu as pltpu


def _round_up(n, m):
    return ((n + m - 1) // m) * m


def cnp_decoder_kernel(x_ref, rb_ref,
                       w1x_ref, w2_ref, b2_ref, w3_ref, b3_ref,
                       out_ref):
    """One (batch, row-tile) per grid step: fused repeat+concat+3-layer MLP.

    x_ref  : (1, tT, x_dim)      rows of x_target
    rb_ref : (1, 1, hidden)      precomputed r @ W1[:r_dim] + b1 for this batch
    out_ref: (1, tT, y_pad)      lane-dense (y padded to a multiple of 128)
    """
    x = x_ref[0]                                            # (tT, x_dim)
    # Layer 1: x-branch on the MXU, r-branch folded into the per-batch bias.
    h = jnp.dot(x, w1x_ref[...],
                preferred_element_type=jnp.float32) + rb_ref[0]   # f32 epilogue
    h = jnp.maximum(h, 0.0)                                 # ReLU (f32, VPU)
    h = h.astype(w2_ref.dtype)
    # Layer 2
    h = jnp.dot(h, w2_ref[...],
                preferred_element_type=jnp.float32) + b2_ref[...]
    h = jnp.maximum(h, 0.0)
    h = h.astype(w3_ref.dtype)
    # Layer 3 (output padded to 128 lanes -> unmasked stores)
    y = jnp.dot(h, w3_ref[...],
                preferred_element_type=jnp.float32) + b3_ref[...]
    out_ref[0] = y.astype(out_ref.dtype)


def cnp_decoder_pallas(r_aggregated, x_target, params, *,
                       compute_dtype=None, row_tile=512):
    """r_aggregated: (B, r_dim), x_target: (B, T, x_dim) -> (B, T, y_dim_out)."""
    w1, b1, w2, b2, w3, b3 = params
    B, T, x_dim = x_target.shape
    r_dim = r_aggregated.shape[-1]
    hidden = w1.shape[1]
    y_dim = w3.shape[1]
    out_dtype = x_target.dtype
    cdt = compute_dtype if compute_dtype is not None else x_target.dtype

    # --- Hoist the r-branch: per-batch first-layer bias (tiny XLA matmul). ---
    rb = (r_aggregated.astype(jnp.float32) @ w1[:r_dim].astype(jnp.float32)
          + b1.astype(jnp.float32))                         # (B, hidden)
    rb3 = rb.reshape(B, 1, hidden)

    # --- Lane-dense output: pad y_dim up to a multiple of 128. ---
    y_pad = _round_up(max(y_dim, 1), 128)
    w3p = jnp.zeros((hidden, y_pad), w3.dtype).at[:, :y_dim].set(w3)
    b3p = jnp.zeros((1, y_pad), jnp.float32).at[:, :y_dim].set(
        b3.astype(jnp.float32))

    # --- Row tiling over T: tT rows per grid step (multiple of 8). ---
    tT = _round_up(T, 8) if T <= row_tile else row_tile
    T_pad = _round_up(T, tT)
    xp = x_target
    if T_pad != T:
        xp = jnp.pad(x_target, ((0, 0), (0, T_pad - T), (0, 0)))
    nT = T_pad // tT

    # --- MXU-side dtypes (accumulation stays f32 inside the kernel). ---
    xc = xp.astype(cdt)
    w1x = w1[r_dim:].astype(cdt)                            # (x_dim, hidden)
    w2c = w2.astype(cdt)
    w3c = w3p.astype(cdt)
    b2_2 = b2.reshape(1, hidden).astype(jnp.float32)

    grid_spec = pltpu.PrefetchScalarGridSpec(
        num_scalar_prefetch=0,
        grid=(B, nT),
        in_specs=[
            pl.BlockSpec((1, tT, x_dim), lambda b, t: (b, t, 0)),
            pl.BlockSpec((1, 1, hidden), lambda b, t: (b, 0, 0)),
            pl.BlockSpec((x_dim, hidden), lambda b, t: (0, 0)),
            pl.BlockSpec((hidden, hidden), lambda b, t: (0, 0)),
            pl.BlockSpec((1, hidden), lambda b, t: (0, 0)),
            pl.BlockSpec((hidden, y_pad), lambda b, t: (0, 0)),
            pl.BlockSpec((1, y_pad), lambda b, t: (0, 0)),
        ],
        out_specs=pl.BlockSpec((1, tT, y_pad), lambda b, t: (b, t, 0)),
    )
    out = pl.pallas_call(
        cnp_decoder_kernel,
        out_shape=jax.ShapeDtypeStruct((B, T_pad, y_pad), out_dtype),
        grid_spec=grid_spec,
        compiler_params=pltpu.CompilerParams(
            dimension_semantics=("parallel", "parallel")),
    )(xc, rb3, w1x, w2c, b2_2, w3c, b3p)

    return out[:, :T, :y_dim]


def cnp_decoder_ref(r_aggregated, x_target, params):
    """Pure-JAX reference matching the PyTorch forward exactly (f32)."""
    w1, b1, w2, b2, w3, b3 = params
    B, T, _ = x_target.shape
    r_rep = jnp.broadcast_to(r_aggregated[:, None, :],
                             (B, T, r_aggregated.shape[-1]))
    rx = jnp.concatenate([r_rep, x_target], axis=-1)
    h = jax.nn.relu(rx @ w1 + b1)
    h = jax.nn.relu(h @ w2 + b2)
    return h @ w3 + b3


def init_params(key, x_dim, r_dim, hidden_dim, y_dim_out):
    """Deterministic synthetic init (nn.Linear-equivalent, stored as (in, out))."""
    ks = jax.random.split(key, 6)
    in1 = r_dim + x_dim

    def lin(kw, kb, fan_in, fan_out):
        bound = 1.0 / jnp.sqrt(fan_in)
        w = jax.random.uniform(kw, (fan_in, fan_out), jnp.float32, -bound, bound)
        b = jax.random.uniform(kb, (fan_out,), jnp.float32, -bound, bound)
        return w, b

    w1, b1 = lin(ks[0], ks[1], in1, hidden_dim)
    w2, b2 = lin(ks[2], ks[3], hidden_dim, hidden_dim)
    w3, b3 = lin(ks[4], ks[5], hidden_dim, y_dim_out)
    return (w1, b1, w2, b2, w3, b3)


if __name__ == "__main__":
    # Small shapes consistent with the module's forward.
    B, T = 2, 8
    x_dim, r_dim, hidden_dim, y_dim_out = 4, 8, 32, 2

    key = jax.random.PRNGKey(0)
    k_r, k_x, k_p = jax.random.split(key, 3)
    r_aggregated = jax.random.normal(k_r, (B, r_dim), jnp.float32)
    x_target = jax.random.normal(k_x, (B, T, x_dim), jnp.float32)
    params = init_params(k_p, x_dim, r_dim, hidden_dim, y_dim_out)

    ref = cnp_decoder_ref(r_aggregated, x_target, params)

    # f32 path (strict correctness check).
    out = jax.block_until_ready(
        cnp_decoder_pallas(r_aggregated, x_target, params))
    assert out.shape == (B, T, y_dim_out), out.shape
    assert jnp.allclose(out, ref, atol=1e-5, rtol=1e-5), \
        float(jnp.max(jnp.abs(out - ref)))

    # bf16 MXU path (v6e/v7x-optimized dtype route), f32 accumulation; loose tol.
    out_bf16 = jax.block_until_ready(
        cnp_decoder_pallas(r_aggregated, x_target, params,
                           compute_dtype=jnp.bfloat16))
    assert out_bf16.shape == (B, T, y_dim_out), out_bf16.shape
    assert jnp.allclose(out_bf16.astype(jnp.float32), ref,
                        atol=1e-1, rtol=1e-1), \
        float(jnp.max(jnp.abs(out_bf16.astype(jnp.float32) - ref)))

    print("KERNEL_OK")
</pallas_src>

<mosaic_0001>
module attributes {stable_mosaic.version = 11 : i64} {
  func.func @cnp_decoder_kernel(%arg0: i32, %arg1: i32, %arg2: memref<1x8x4xf32, #tpu.memory_space<vmem>>, %arg3: memref<1x1x32xf32, #tpu.memory_space<vmem>>, %arg4: memref<4x32xf32, #tpu.memory_space<vmem>>, %arg5: memref<32x32xf32, #tpu.memory_space<vmem>>, %arg6: memref<1x32xf32, #tpu.memory_space<vmem>>, %arg7: memref<32x128xf32, #tpu.memory_space<vmem>>, %arg8: memref<1x128xf32, #tpu.memory_space<vmem>>, %arg9: memref<1x8x128xf32, #tpu.memory_space<vmem>>) attributes {dimension_semantics = [#tpu.dimension_semantics<parallel>, #tpu.dimension_semantics<parallel>], iteration_bounds = array<i64: 2, 1>, scalar_prefetch = 0 : i64, scratch_operands = 0 : i64, tpu.core_type = #tpu.core_type<tc>, window_params = [{transform_indices = @transform_0, window_bounds = array<i64: 1, 8, 4>}, {transform_indices = @transform_1, window_bounds = array<i64: 1, 1, 32>}, {pipeline_mode = #tpu.pipeline_mode<synchronous>, transform_indices = @transform_2, window_bounds = array<i64: 4, 32>}, {pipeline_mode = #tpu.pipeline_mode<synchronous>, transform_indices = @transform_3, window_bounds = array<i64: 32, 32>}, {pipeline_mode = #tpu.pipeline_mode<synchronous>, transform_indices = @transform_4, window_bounds = array<i64: 1, 32>}, {pipeline_mode = #tpu.pipeline_mode<synchronous>, transform_indices = @transform_5, window_bounds = array<i64: 32, 128>}, {pipeline_mode = #tpu.pipeline_mode<synchronous>, transform_indices = @transform_6, window_bounds = array<i64: 1, 128>}, {transform_indices = @transform_7, window_bounds = array<i64: 1, 8, 128>}]} {
    %c0 = arith.constant 0 : index
    %c0_0 = arith.constant 0 : index
    %c0_1 = arith.constant 0 : index
    %0 = vector.load %arg2[%c0, %c0_0, %c0_1] : memref<1x8x4xf32, #tpu.memory_space<vmem>>, vector<1x8x4xf32>
    %1 = vector.shape_cast %0 : vector<1x8x4xf32> to vector<8x4xf32>
    %c0_2 = arith.constant 0 : index
    %c0_3 = arith.constant 0 : index
    %2 = vector.load %arg4[%c0_2, %c0_3] : memref<4x32xf32, #tpu.memory_space<vmem>>, vector<4x32xf32>
    %cst = arith.constant dense<0.000000e+00> : vector<8x32xf32>
    %3 = tpu.matmul %1, %2, %cst {dimension_numbers = #tpu.dot_dimension_numbers<[1], [0], [0], [1], [0, 0, 1, 1], [], []>} : vector<8x4xf32>, vector<4x32xf32>, vector<8x32xf32> -> vector<8x32xf32>
    %c0_4 = arith.constant 0 : index
    %c0_5 = arith.constant 0 : index
    %c0_6 = arith.constant 0 : index
    %4 = vector.load %arg3[%c0_4, %c0_5, %c0_6] : memref<1x1x32xf32, #tpu.memory_space<vmem>>, vector<1x1x32xf32>
    %5 = vector.shape_cast %4 : vector<1x1x32xf32> to vector<1x32xf32>
    %6 = vector.broadcast %5 : vector<1x32xf32> to vector<8x32xf32>
    %7 = arith.addf %3, %6 : vector<8x32xf32>
    %cst_7 = arith.constant 0.000000e+00 : f32
    %8 = vector.broadcast %cst_7 : f32 to vector<8x32xf32>
    %9 = arith.maximumf %7, %8 : vector<8x32xf32>
    %c0_8 = arith.constant 0 : index
    %c0_9 = arith.constant 0 : index
    %10 = vector.load %arg5[%c0_8, %c0_9] : memref<32x32xf32, #tpu.memory_space<vmem>>, vector<32x32xf32>
    %cst_10 = arith.constant dense<0.000000e+00> : vector<8x32xf32>
    %11 = tpu.matmul %9, %10, %cst_10 {dimension_numbers = #tpu.dot_dimension_numbers<[1], [0], [0], [1], [0, 0, 1, 1], [], []>} : vector<8x32xf32>, vector<32x32xf32>, vector<8x32xf32> -> vector<8x32xf32>
    %c0_11 = arith.constant 0 : index
    %c0_12 = arith.constant 0 : index
    %12 = vector.load %arg6[%c0_11, %c0_12] : memref<1x32xf32, #tpu.memory_space<vmem>>, vector<1x32xf32>
    %13 = vector.broadcast %12 : vector<1x32xf32> to vector<8x32xf32>
    %14 = arith.addf %11, %13 : vector<8x32xf32>
    %cst_13 = arith.constant 0.000000e+00 : f32
    %15 = vector.broadcast %cst_13 : f32 to vector<8x32xf32>
    %16 = arith.maximumf %14, %15 : vector<8x32xf32>
    %c0_14 = arith.constant 0 : index
    %c0_15 = arith.constant 0 : index
    %17 = vector.load %arg7[%c0_14, %c0_15] : memref<32x128xf32, #tpu.memory_space<vmem>>, vector<32x128xf32>
    %cst_16 = arith.constant dense<0.000000e+00> : vector<8x128xf32>
    %18 = tpu.matmul %16, %17, %cst_16 {dimension_numbers = #tpu.dot_dimension_numbers<[1], [0], [0], [1], [0, 0, 1, 1], [], []>} : vector<8x32xf32>, vector<32x128xf32>, vector<8x128xf32> -> vector<8x128xf32>
    %c0_17 = arith.constant 0 : index
    %c0_18 = arith.constant 0 : index
    %19 = vector.load %arg8[%c0_17, %c0_18] : memref<1x128xf32, #tpu.memory_space<vmem>>, vector<1x128xf32>
    %20 = vector.broadcast %19 : vector<1x128xf32> to vector<8x128xf32>
    %21 = arith.addf %18, %20 : vector<8x128xf32>
    %c0_19 = arith.constant 0 : index
    %c0_20 = arith.constant 0 : index
    %c0_21 = arith.constant 0 : index
    %22 = vector.load %arg9[%c0_19, %c0_20, %c0_21] : memref<1x8x128xf32, #tpu.memory_space<vmem>>, vector<1x8x128xf32>
    %23 = vector.shape_cast %22 : vector<1x8x128xf32> to vector<8x128xf32>
    %24 = vector.shape_cast %21 : vector<8x128xf32> to vector<1x8x128xf32>
    tpu.vector_store %arg9[%c0_19, %c0_20, %c0_21], %24 {strides = array<i32>} : memref<1x8x128xf32, #tpu.memory_space<vmem>>, vector<1x8x128xf32>,
    return
  }
  func.func @transform_0(%arg0: i32, %arg1: i32) -> (i32, i32, i32) {
    %c0_i32 = arith.constant 0 : i32
    %c0_i32_0 = arith.constant 0 : i32
    return %arg0, %arg1, %c0_i32 : i32, i32, i32
  }
  func.func @transform_1(%arg0: i32, %arg1: i32) -> (i32, i32, i32) {
    %c0_i32 = arith.constant 0 : i32
    %c0_i32_0 = arith.constant 0 : i32
    %c0_i32_1 = arith.constant 0 : i32
    return %arg0, %c0_i32, %c0_i32_0 : i32, i32, i32
  }
  func.func @transform_2(%arg0: i32, %arg1: i32) -> (i32, i32) {
    %c0_i32 = arith.constant 0 : i32
    %c0_i32_0 = arith.constant 0 : i32
    %c0_i32_1 = arith.constant 0 : i32
    return %c0_i32, %c0_i32_0 : i32, i32
  }
  func.func @transform_3(%arg0: i32, %arg1: i32) -> (i32, i32) {
    %c0_i32 = arith.constant 0 : i32
    %c0_i32_0 = arith.constant 0 : i32
    %c0_i32_1 = arith.constant 0 : i32
    return %c0_i32, %c0_i32_0 : i32, i32
  }
  func.func @transform_4(%arg0: i32, %arg1: i32) -> (i32, i32) {
    %c0_i32 = arith.constant 0 : i32
    %c0_i32_0 = arith.constant 0 : i32
    %c0_i32_1 = arith.constant 0 : i32
    return %c0_i32, %c0_i32_0 : i32, i32
  }
  func.func @transform_5(%arg0: i32, %arg1: i32) -> (i32, i32) {
    %c0_i32 = arith.constant 0 : i32
    %c0_i32_0 = arith.constant 0 : i32
    %c0_i32_1 = arith.constant 0 : i32
    return %c0_i32, %c0_i32_0 : i32, i32
  }
  func.func @transform_6(%arg0: i32, %arg1: i32) -> (i32, i32) {
    %c0_i32 = arith.constant 0 : i32
    %c0_i32_0 = arith.constant 0 : i32
    %c0_i32_1 = arith.constant 0 : i32
    return %c0_i32, %c0_i32_0 : i32, i32
  }
  func.func @transform_7(%arg0: i32, %arg1: i32) -> (i32, i32, i32) {
    %c0_i32 = arith.constant 0 : i32
    %c0_i32_0 = arith.constant 0 : i32
    return %arg0, %arg1, %c0_i32 : i32, i32, i32
  }
}

</mosaic_0001>

<bundles_post_ra>
// kernel: tpu_custom_call.1
= control target key start
LH: loop header
LB: loop body
LE: loop exit
PB: predicated region body
PF: predicated region fallthrough
CT: control target
= control target key end

     0   :  { %12 = vsyncpa [#allocation3], 0  ;;  %s995_s0 = inlined_call_operand.vmem [shape: f32[2,8,4], index: 0, kind: input, shape index: {}]   ;;  %s996_s1 = inlined_call_operand.vmem [shape: f32[2,1,32], index: 1, kind: input, shape index: {}]   ;;  %s997_s2 = inlined_call_operand.vmem [shape: f32[4,32], index: 2, kind: input, shape index: {}]   ;;  %s998_s3 = inlined_call_operand.hbm [shape: f32[32,32], index: 3, kind: input, shape index: {}]   ;;  %s999_s4 = inlined_call_operand.vmem [shape: f32[1,32], index: 4, kind: input, shape index: {}]   ;;  %s1000_s5 = inlined_call_operand.hbm [shape: f32[32,128], index: 5, kind: input, shape index: {}]   ;;  %s1001_s6 = inlined_call_operand.vmem [shape: f32[1,128], index: 6, kind: input, shape index: {}]   ;;  %s1002_s7 = inlined_call_operand.hbm [shape: f32[2,8,128], index: 7, kind: output, shape index: {}]  }
   0x1   :  { %13 = vsyncpa [#allocation6], 0 }
   0x2   :  { %14 = vsyncpa [#allocation4], 0 }
   0x3   :  { %16 = vsyncpa [#allocation4 + $0x1], 0  ;;  %s858_s24 = smov 0   ;;  %s860_s25 = smov 0  }
   0x4   :  { %s862_s26 = smov 0   ;;  %s864_s27 = smov 0  }
   0x5   :  { %s866_s28 = smov 0   ;;  %s868_s29 = smov 0  }
   0x6 LB: > { %s566_s30 = sadd.s32 4294967295, %s812_s29   ;;  %s567_s8 = sadd.s32 4294967294, %s812_s29   ;;  %s812_s29 = sphi %s868_s29, %s22_s29   ;;  %s808_s28 = sphi %s866_s28, %s1011_s28   ;;  %s804_s27 = sphi %s864_s27, %s1010_s27   ;;  %s800_s26 = sphi %s862_s26, %s1009_s26   ;;  %s796_s25 = sphi %s860_s25, %s1008_s25   ;;  %s792_s24 = sphi %s858_s24, %s1007_s24  }
   0x7   : > { %s34_s9 = sadd.s32 1, %s808_s28  ;;  %s202_s10 = sadd.s32 1, %s800_s26 }
   0x8   : > { %p36_p0 = scmp.ge.s32.totalorder %s34_s9, 2  ;;  %p212_p1 = scmp.ne.s32.totalorder %s800_s26, %s796_s25 }
   0x9   : > { %p213_p2 = scmp.eq.s32.totalorder %s566_s30, 1  ;;  %p218_p3 = scmp.ne.s32.totalorder %s796_s25, %s792_s24 }
   0xa   : > { %s1013_s9 = smov (%p36_p0, %s34_s9), 0  ;;  %p219_p5 = scmp.eq.s32.totalorder %s567_s8, 1 }
   0xb   : > { %p898_p4 = por %p213_p2, %p212_p1  ;;  %s197_s12 = ssub.s32 %s808_s28, %s1013_s9 }
   0xc   : > { %p568_p6 = scmp.ge.s32.totalorder %s812_s29, 1  ;;  %p200_p7 = scmp.eq.s32.totalorder %s197_s12, 0 }
   0xd   : > { %p905_p8 = por %p219_p5, %p218_p3  ;;  %p226_p9 = scmp.lt.s32.totalorder %s812_s29, 3 }
   0xe   : > { %s911_s14 = scalar_select %p200_p7, %s800_s26, %s202_s10  }
   0xf   : > { %p913_p10 = pnand %p568_p6, %p226_p9  ;;  %p917_p11 = scmp.eq.s32.totalorder %s566_s30, 0 }
  0x10   : > { %s240_s19 = sshll.u32 %s998_s3, 4  ;;  %s814_s20 = smov [#allocation2]   ;;  %s241_s19 = int_to_ptr.hbm [resolvable:$true] %s240_s19 }
  0x11   : > { %p595_p12 = pneg %p913_p10  ;;  %s242_s21 = sshll.u32 %s814_s20, 4  ;;  %s243_s21 = int_to_ptr.vmem [resolvable:$true] %s242_s21 }
  0x12   : > { %s257_s30 = sshll.u32 %s1000_s5, 4  ;;  %s815_s8 = smov 128   ;;  %s258_s30 = int_to_ptr.hbm [resolvable:$true] %s257_s30 }
  0x13   : > { %p596_p13 = pnand %p917_p11, %p595_p12  ;;  %s816_s10 = smov 8  }
  0x14   : > { %s817_s12 = smov [#allocation5]   ;;  %294 = sbr.rel (%p913_p10) target bundleno = 432 (0x1b0), region = 48 }
  0x15   : > { %598 = dma.hbm_to_vmem [thread:$0]  (!%p596_p13), %s241_s19, 512, %s243_s21, [#allocation3], %s815_s8, %s815_s8, %s816_s10  }
  0x16   : > { %s259_s17 = sshll.u32 %s817_s12, 4  ;;  %s260_s17 = int_to_ptr.vmem [resolvable:$true] %s259_s17 }
  0x17   : > { %601 = dma.hbm_to_vmem [thread:$0]  (!%p596_p13), %s258_s30, 512, %s260_s17, [#allocation6], %s815_s8, %s815_s8, %s816_s10  }
  0x19   : > { %779 = dma.done.wait (%p917_p11), [#allocation3], 512  }
  0x1a   : > { %781 = vsyncadd (%p917_p11), [#allocation3], 4294966784 }
  0x1b   : > { %783 = dma.done.wait (%p917_p11), [#allocation6], 512  }
  0x1c   : > { %785 = vsyncadd (%p917_p11), [#allocation6], 4294966784  ;;  %p337_p0 = scmp.lt.s32.totalorder %s804_s27, 1  ;;  %vm357_vm0 = vcmask 1043456   ;;  %vm353_vm1 = vcmask 31744   ;;  %v385_v2 = vld [vmem:[#allocation2 + $0x18] sm:$0xff] }
  0x1d   : > { %v348_v0 = vld [vmem:[%s997_s2] sm:$0xf]  ;;  %406 = vmatpush.msra.mxu1 %v385_v2  ;;  %v384_v3 = vld [vmem:[#allocation2 + $0x10] sm:$0xff]  ;;  %v383_v4 = vld [vmem:[#allocation2 + $0x8] sm:$0xff]  ;;  %vm390_vm2 = vcmask 261120   ;;  %s334_s17 = sand.u32 1, %s796_s25  }
  0x1e   : > { %s338_s18 = scalar_select %p337_p0, %s804_s27, 1  ;;  %577 = vmatpush.msk.msra.mxu0 %vm357_vm0, %v348_v0  ;;  %v382_v5 = vld [vmem:[#allocation2] sm:$0xff]  ;;  %v418_v6 = vld [vmem:[#allocation5 + $0x18] sm:$0xff]  ;;  %v417_v11 = vld [vmem:[#allocation5 + $0x10] sm:$0xff] }
  0x1f   : > { %407 = vmatpush.msra.mxu1 %v384_v3  ;;  %438 = vmatpush.msra.mxu2 %v418_v6  ;;  %v416_v12 = vld [vmem:[#allocation5 + $0x8] sm:$0xff]  ;;  %v415_v13 = vld [vmem:[#allocation5] sm:$0xff]  ;;  %s448_s10 = scalar_lea.sflag [#allocation4], %s334_s17  ;;  %s746_s20 = scalar_lea.hbm %s1002_s7, 16 }
  0x20   : > { %s576_s19 = sshll.u32 %s338_s18, 3  ;;  %s346_s8 = scalar_lea.vmem %s996_s1, %s338_s18  ;;  %v664_v14 = vld [vmem:[%s999_s4] ss:$0 sm:$0xff] }
  0x21   : > { %s343_s21 = scalar_lea.vmem %s995_s0, %s576_s19  ;;  %408 = vmatpush.msra.mxu1 %v383_v4  ;;  %v663_v7 = vld [vmem:[%s346_s8] ss:$0 sm:$0xff]  ;;  %439 = vmatpush.msra.mxu2 %v417_v11  ;;  %s575_s18 = sshll.u32 %s334_s17, 3 }
  0x22   : > { %v347_v1 = vld [vmem:[%s343_s21] sm:$0xff]  ;;  %s582_s19 = sshll.u32 %s804_s27, 3  ;;  %s336_s30 = scalar_lea.vmem [#allocation7], %s575_s18 }
  0x23   : > { %578 = vmatmul.msk.f32.vlgmr.msra.gmra.mxu0 %vm353_vm1, %v347_v1  ;;  %409 = vmatpush.msra.mxu1 %v382_v5  ;;  %s459_s21 = scalar_lea.hbm %s1002_s7, %s582_s19  ;;  %v665_v18 = vld [vmem:[%s1001_s6] ss:$0 sm:$0xff]  ;;  %s461_s16 = sshll.u32 %s336_s30, 4  ;;  %s462_s16 = int_to_ptr.vmem [resolvable:$true] %s461_s16 }
  0x24   : > { %440 = vmatpush.msra.mxu2 %v416_v12  ;;  %s463_s8 = sshll.u32 %s459_s21, 4  ;;  %s464_s8 = int_to_ptr.hbm [resolvable:$true] %s463_s8 }
  0x25   : > { %s740_s12 = sshra.s32 %s464_s8, 4  ;;  %s741_s12 = int_to_ptr.hbm [resolvable:$true] %s740_s12 }
  0x26   : > { %441 = vmatpush.msra.mxu2 %v415_v13  ;;  %s742_s27 = scalar_lea.hbm %s741_s12, 8  ;;  %p747_p5 = scmp.lt.s32.totalorder %s741_s12, %s1002_s7 }
  0x27   : > { %p743_p1 = scmp.ne.s32.totalorder %s741_s12, %s742_s27  ;;  %p748_p6 = scmp.lt.s32.totalorder %s746_s20, %s742_s27 }
  0x29   : > { %p744_p2 = pnand %p743_p1, %p898_p4  ;;  %p749_p7 = por %p748_p6, %p747_p5 }
  0x2b   : > { %p745_p3 = pneg %p744_p2 }
  0x2d   : > { %p750_p9 = pnand %p749_p7, %p745_p3 }
  0xa0   : > { %v378_v8 = vpop.f32.mrf.mxu0 }
  0xa1   : > { %v379_v9 = vadd.f32 %v663_v7, %v378_v8 }
  0xa3   : > { %v381_v10 = vmax.f32 %v379_v9, 0.0 }
  0xa5   : > { %579 = vmatmul.msk.f32.vlgmr.msra.gmra.mxu1 %vm390_vm2, %v381_v10 }
 0x122   : > { %v411_v15 = vpop.f32.mrf.mxu1 }
 0x123   : > { %v412_v16 = vadd.f32 %v664_v14, %v411_v15 }
 0x125   : > { %v414_v17 = vmax.f32 %v412_v16, 0.0 }
 0x127   : > { %580 = vmatmul.msk.f32.vlgmr.msra.gmra.mxu2 %vm390_vm2, %v414_v17 }
 0x1aa   : > { %v443_v19 = vpop.f32.mrf.mxu2 }
 0x1ab   : > { %v444_v20 = vadd.f32 %v665_v18, %v443_v19 }
 0x1ad   : > { %446 = vst [vmem:[%s336_s30] sm:$0xff] %v444_v20 }
 0x1ae   : > { %753 = shalt.err (!%p750_p9)
}
 0x1af   : > { %593 = dma.vmem_to_hbm [thread:$0]  (%p898_p4), %s462_s16, 128, %s464_s8, %s448_s10  }
 0x1b0 PF: > { %p610_p10 = scmp.ge.s32.totalorder %s812_s29, 2  ;;  %s475_s17 = sand.u32 1, %s792_s24  }
 0x1b1   : > { %s476_s21 = scalar_lea.sflag [#allocation4], %s475_s17 }
 0x1b2   : > { %p603_p11 = pnand %p610_p10, %p905_p8 }
 0x1b4   : > { %p604_p12 = pneg %p603_p11 }
 0x1b6   : > { %787 = dma.done.wait (%p604_p12), %s476_s21, 128  }
 0x1b7   : > { %789 = vsyncadd (%p604_p12), %s476_s21, 4294967168  ;;  %s22_s29 = sadd.s32 1, %s812_s29   ;;  %s1007_s24 = smov %s796_s25 }
 0x1b8   : > { %p19_p13 = scmp.ge.s32.totalorder %s22_s29, 4   ;;  %s1008_s25 = smov %s800_s26 }
 0x1b9   : > { %s1009_s26 = smov %s911_s14  ;;  %s1010_s27 = smov %s808_s28 }
 0x1ba   : > { %s1011_s28 = smov %s1013_s9  ;;  %21 = sbr.rel (!%p19_p13) target bundleno = 6 (0x6), region = 95 }
 0x1bf   :  { %482 = vsyncpa [#allocation3], 1 }
 0x1c0   :  { %484 = vsyncpa [#allocation3 + $0x1], 1 }
 0x1c1   :  { %485 = vsyncpa [#allocation6], 1 }
 0x1c2   :  { %486 = vsyncpa [#allocation4], 1 }
 0x1c3   :  { %488 = vsyncpa [#allocation4 + $0x1], 1 }

</bundles_post_ra>
